<compile_context>
chip_gen: v7x
topology: tpu7x:2x2x1
jax: 0.10.0
libtpu: 0.0.40
codegen_flags: <defaults>
</compile_context>

<pallas_src>
import math
from functools import partial

import jax
import jax.numpy as jnp
from jax.experimental import pallas as pl
from jax.experimental.pallas import tpu as pltpu

LANES = 128
_TARGET_BLOCK_BYTES = 2 * 1024 * 1024  # ~2 MiB per stream (v7x-safe, near roofline)


def make_positional_encoding(d_model: int, max_seq_length: int = 5000,
                             dtype=jnp.float32):
    """Replicates the PyTorch buffer: interleaved sin/cos positional table."""
    if d_model % 2 != 0:
        # Same practical limitation as the PyTorch module.
        raise ValueError("d_model must be even")
    position = jnp.arange(max_seq_length, dtype=jnp.float32)[:, None]          # (L, 1)
    div_term = jnp.exp(
        jnp.arange(0, d_model, 2, dtype=jnp.float32)
        * -(math.log(10000.0) / d_model)
    )                                                                            # (D/2,)
    angles = position * div_term                                                 # (L, D/2)
    pe = jnp.zeros((max_seq_length, d_model), jnp.float32)
    pe = pe.at[:, 0::2].set(jnp.sin(angles))
    pe = pe.at[:, 1::2].set(jnp.cos(angles))
    return pe.astype(dtype)


def prepare_pe(pe_table, seq_len: int, out_dtype):
    """Hoisted, once-per-(S, dtype) preparation of the lane-dense pe tile.

    Slices pe[:S], casts to the (promoted) output dtype, flattens, and
    zero-pads up to a multiple of 128 lanes -> shape (rows, 128).
    """
    d_model = pe_table.shape[1]
    flat = seq_len * d_model
    padded = pl.cdiv(flat, LANES) * LANES
    pe = pe_table[:seq_len].astype(out_dtype).reshape(flat)
    if padded != flat:
        pe = jnp.pad(pe, (0, padded - flat))
    return pe.reshape(padded // LANES, LANES)


def _add_pe_kernel(x_ref, pe_ref, out_ref):
    # x_ref / out_ref: (TB, rows, 128) batch-tile; pe_ref: (rows, 128), the
    # single resident tile (constant index_map).  One fused VPU add with the
    # pe tile broadcast over the TB batch elements; lane-dense store.
    out_ref[...] = x_ref[...].astype(out_ref.dtype) + pe_ref[...]


@jax.jit
def positional_encoding(x, pe_rows):
    """out = x + pe[:x.shape[1]] via a Pallas TPU kernel.

    `pe_rows` is the prepared lane-dense pe tile from `prepare_pe`.
    """
    B, S, D = x.shape
    rows, lanes = pe_rows.shape
    out_dtype = pe_rows.dtype            # already the PyTorch-promoted dtype
    flat = S * D
    padded = rows * lanes
    assert padded >= flat, "pe_rows was prepared for a shorter sequence"

    # Lane-dense, padded presentation of x: (B, rows, 128).
    x_flat = x.reshape(B, flat)
    if padded != flat:
        x_flat = jnp.pad(x_flat, ((0, 0), (0, padded - flat)))
    x_r = x_flat.reshape(B, rows, lanes)

    # Batch tile: largest divisor of B whose per-stream block stays <= ~2 MiB.
    # Tiny inputs collapse to a single grid step; large inputs get many
    # ~0.5-2 MiB steps (enough steps for both v7x TensorCores to share).
    bytes_per_batch = rows * lanes * jnp.dtype(out_dtype).itemsize
    max_tb = max(1, _TARGET_BLOCK_BYTES // max(bytes_per_batch, 1))
    tb = 1
    for cand in range(1, B + 1):
        if B % cand == 0 and cand <= max_tb:
            tb = cand
    grid = (B // tb,)

    out = pl.pallas_call(
        _add_pe_kernel,
        out_shape=jax.ShapeDtypeStruct((B, rows, lanes), out_dtype),
        grid_spec=pltpu.PrefetchScalarGridSpec(
            num_scalar_prefetch=0,
            grid=grid,
            in_specs=[
                # x: TB batch elements per grid step.
                pl.BlockSpec((tb, rows, lanes), lambda i: (i, 0, 0)),
                # pe: constant index_map -> fetched once, resident across grid.
                pl.BlockSpec((rows, lanes), lambda i: (0, 0)),
            ],
            out_specs=pl.BlockSpec((tb, rows, lanes), lambda i: (i, 0, 0)),
        ),
        compiler_params=pltpu.CompilerParams(
            # Batch-tile axis is fully independent -> megacore sharding on v7x;
            # on v5e/v6e it is a (short) serial loop.
            dimension_semantics=("parallel",),
        ),
    )(x_r, pe_rows)

    out = out.reshape(B, padded)
    if padded != flat:
        out = out[:, :flat]
    return out.reshape(B, S, D)


def reference_positional_encoding(x, pe_table):
    """Pure-JAX reference reproducing the PyTorch forward (incl. promotion)."""
    S = x.shape[1]
    out_dtype = jnp.promote_types(x.dtype, pe_table.dtype)
    return x.astype(out_dtype) + pe_table[None, :S].astype(out_dtype)


if __name__ == "__main__":
    B, S, D = 2, 8, 32
    MAX_SEQ = 5000

    key = jax.random.PRNGKey(0)
    x = jax.random.normal(key, (B, S, D), jnp.float32)

    # Module "init": build the buffer + the prepared lane-dense pe tile once.
    pe_table = make_positional_encoding(D, MAX_SEQ, jnp.float32)
    out_dtype = jnp.promote_types(x.dtype, pe_table.dtype)
    pe_rows = prepare_pe(pe_table, S, out_dtype)

    out = positional_encoding(x, pe_rows)
    out = jax.block_until_ready(out)

    ref = reference_positional_encoding(x, pe_table)
    assert out.shape == (B, S, D)
    assert out.dtype == out_dtype
    assert jnp.allclose(out, ref, atol=1e-6, rtol=1e-6), (
        float(jnp.max(jnp.abs(out - ref)))
    )
    print("KERNEL_OK")
</pallas_src>

<mosaic_0001>
module attributes {stable_mosaic.version = 11 : i64} {
  func.func @_add_pe_kernel(%arg0: i32, %arg1: memref<2x2x128xf32, #tpu.memory_space<vmem>>, %arg2: memref<2x128xf32, #tpu.memory_space<vmem>>, %arg3: memref<2x2x128xf32, #tpu.memory_space<vmem>>) attributes {dimension_semantics = [#tpu.dimension_semantics<parallel>], iteration_bounds = array<i64: 1>, scalar_prefetch = 0 : i64, scratch_operands = 0 : i64, tpu.core_type = #tpu.core_type<tc>, window_params = [{transform_indices = @transform_0, window_bounds = array<i64: 2, 2, 128>}, {pipeline_mode = #tpu.pipeline_mode<synchronous>, transform_indices = @transform_1, window_bounds = array<i64: 2, 128>}, {transform_indices = @transform_2, window_bounds = array<i64: 2, 2, 128>}]} {
    %c0 = arith.constant 0 : index
    %c0_0 = arith.constant 0 : index
    %c0_1 = arith.constant 0 : index
    %0 = vector.load %arg1[%c0, %c0_0, %c0_1] : memref<2x2x128xf32, #tpu.memory_space<vmem>>, vector<2x2x128xf32>
    %c0_2 = arith.constant 0 : index
    %c0_3 = arith.constant 0 : index
    %1 = vector.load %arg2[%c0_2, %c0_3] : memref<2x128xf32, #tpu.memory_space<vmem>>, vector<2x128xf32>
    %2 = vector.shape_cast %1 : vector<2x128xf32> to vector<1x2x128xf32>
    %3 = vector.broadcast %2 : vector<1x2x128xf32> to vector<2x2x128xf32>
    %4 = arith.addf %0, %3 : vector<2x2x128xf32>
    %c0_4 = arith.constant 0 : index
    %c0_5 = arith.constant 0 : index
    %c0_6 = arith.constant 0 : index
    %5 = vector.load %arg3[%c0_4, %c0_5, %c0_6] : memref<2x2x128xf32, #tpu.memory_space<vmem>>, vector<2x2x128xf32>
    tpu.vector_store %arg3[%c0_4, %c0_5, %c0_6], %4 {strides = array<i32>} : memref<2x2x128xf32, #tpu.memory_space<vmem>>, vector<2x2x128xf32>,
    return
  }
  func.func @transform_0(%arg0: i32) -> (i32, i32, i32) {
    %c0_i32 = arith.constant 0 : i32
    %c0_i32_0 = arith.constant 0 : i32
    %c0_i32_1 = arith.constant 0 : i32
    return %arg0, %c0_i32, %c0_i32_0 : i32, i32, i32
  }
  func.func @transform_1(%arg0: i32) -> (i32, i32) {
    %c0_i32 = arith.constant 0 : i32
    %c0_i32_0 = arith.constant 0 : i32
    %c0_i32_1 = arith.constant 0 : i32
    return %c0_i32, %c0_i32_0 : i32, i32
  }
  func.func @transform_2(%arg0: i32) -> (i32, i32, i32) {
    %c0_i32 = arith.constant 0 : i32
    %c0_i32_0 = arith.constant 0 : i32
    %c0_i32_1 = arith.constant 0 : i32
    return %arg0, %c0_i32, %c0_i32_0 : i32, i32, i32
  }
}

</mosaic_0001>

<bundles_post_ra>
// kernel: positional_encoding.1
= control target key start
LH: loop header
LB: loop body
LE: loop exit
PB: predicated region body
PF: predicated region fallthrough
CT: control target
= control target key end

     0   :  { %s52_s0 = inlined_call_operand.vmem [shape: f32[2,2,128], index: 0, kind: input, shape index: {}]   ;;  %s53_s1 = inlined_call_operand.vmem [shape: f32[2,128], index: 1, kind: input, shape index: {}]   ;;  %s54_s2 = inlined_call_operand.vmem [shape: f32[2,2,128], index: 2, kind: output, shape index: {}]  }
   0x1   :  { %v11_v0 = vld [vmem:[%s52_s0] sm:$0x3]  ;;  %v12_v2 = vld [vmem:[%s52_s0 + $0x2] sm:$0x3] }
   0x2   :  { %v13_v1 = vld [vmem:[%s53_s1] sm:$0x3] }
   0x3   :  { %v14_v3 = vadd.f32 %v13_v1, %v11_v0  ;;  %v15_v4 = vadd.f32 %v13_v1, %v12_v2 }
   0x5   :  { %16 = vst [vmem:[%s54_s2] sm:$0x3] %v14_v3  ;;  %17 = vst [vmem:[%s54_s2 + $0x2] sm:$0x3] %v15_v4 }

</bundles_post_ra>
